<compile_context>
chip_gen: v5e
topology: v5e:2x2
jax: 0.10.0
libtpu: 0.0.40
codegen_flags: <defaults>
</compile_context>

<pallas_src>
import math

import jax
import jax.numpy as jnp
from jax.experimental import pallas as pl
from jax.experimental.pallas import tpu as pltpu


def _round_up(x, m):
    return (x + m - 1) // m * m


def _device_kind():
    try:
        return jax.devices()[0].device_kind.lower()
    except Exception:
        return ""


# --------------------------- kernels ---------------------------------------


def _fused_kernel(x_ref, w_ref, o_ref):
    # Full-K dot per block; used by both the x-resident (1-D grid over j) and
    # weight-resident (2-D grid (j, i)) paths.  The operand whose block index
    # is constant across the inner steps stays resident in VMEM (no re-DMA).
    o_ref[...] = jnp.dot(
        x_ref[...], w_ref[...], preferred_element_type=jnp.float32
    ).astype(o_ref.dtype)


def _accum_out_kernel(x_ref, w_ref, o_ref):
    # 3-D grid (i, j, k), k last + "arbitrary": the f32 output block is
    # resident across k and doubles as the accumulator.
    @pl.when(pl.program_id(2) == 0)
    def _():
        o_ref[...] = jnp.zeros_like(o_ref)

    o_ref[...] += jnp.dot(
        x_ref[...], w_ref[...], preferred_element_type=jnp.float32
    )


def _accum_scratch_kernel(x_ref, w_ref, o_ref, acc_ref):
    # K-split fallback when the requested output dtype is not f32.
    @pl.when(pl.program_id(2) == 0)
    def _():
        acc_ref[...] = jnp.zeros_like(acc_ref)

    acc_ref[...] += jnp.dot(
        x_ref[...], w_ref[...], preferred_element_type=jnp.float32
    )

    @pl.when(pl.program_id(2) == pl.num_programs(2) - 1)
    def _():
        o_ref[...] = acc_ref[...].astype(o_ref.dtype)


# --------------------------- weight preparation ------------------------------


def prepare_projector_weight(weight, compute_dtype=jnp.bfloat16):
    """One-time weight prep.  Do this ONCE at init and cache the result.

    weight : (dim, 4*vision_hidden_size)  -- PyTorch nn.Linear layout.
    Returns: (K_pad, dim) array in `compute_dtype`, K zero-padded to 128.
    """
    n, k = weight.shape
    k_pad = _round_up(k, 128)
    w_t = jnp.asarray(weight).T.astype(compute_dtype)  # (K, N)
    if k_pad != k:
        w_t = jnp.pad(w_t, ((0, k_pad - k), (0, 0)))
    return w_t


# --------------------------- forward wrapper --------------------------------


def vision_projector(x, w_prepared, *, tm=None, tn=None, tk=None,
                     out_dtype=None, path=None):
    """Forward of nn.Linear(4*vision_hidden_size, dim, bias=False).

    x          : (..., K) array (K = 4 * vision_hidden_size).
    w_prepared : (K_pad, N) from `prepare_projector_weight` (cached at init).
    out_dtype  : output dtype (default: x.dtype).  MXU compute happens in
                 w_prepared.dtype (bf16 by default), accumulation in f32.
    path       : None (auto) | "x_resident" | "w_resident" | "k_split".
    """
    *lead, K = x.shape
    K_pad, N = w_prepared.shape
    assert K_pad == _round_up(K, 128), (
        f"w_prepared K dim {K_pad} does not match round_up({K},128)")
    M = math.prod(lead) if lead else 1
    compute_dtype = w_prepared.dtype
    out_dtype = x.dtype if out_dtype is None else out_dtype

    if M == 0:  # degenerate leading dim
        return jnp.zeros((*lead, N), dtype=out_dtype)

    cb = jnp.dtype(compute_dtype).itemsize
    ob = jnp.dtype(out_dtype).itemsize

    # ---- generation-aware tiles / VMEM budget -------------------------------
    kind = _device_kind()
    is_v7 = "v7" in kind
    is_v6 = "v6" in kind

    if tm is None:
        tm = 256
    if tn is None:
        # Arithmetic-intensity targets: v6e ~680 flops/byte -> tn=1024,
        # v7x ~310 -> tn=512, v5e ~240 -> tn=512.
        tn = 512 if is_v7 else (1024 if is_v6 else 512)
    if tk is None:
        tk = 512

    sub = 16 if compute_dtype == jnp.bfloat16 else 8
    tm = _round_up(min(tm, _round_up(M, sub)), sub)
    tn = _round_up(min(tn, _round_up(N, 128)), 128)
    tk = _round_up(min(tk, K_pad), 128)

    vmem_cap = (56 if is_v7 else 100) << 20       # v7x has 64 MiB VMEM
    vmem_budget = (44 if is_v7 else 88) << 20

    # ---- x: cast to compute dtype + (rarely) pad ragged K -------------------
    x2d = x.reshape(M, K)
    if x2d.dtype != compute_dtype:
        x2d = x2d.astype(compute_dtype)
    if K_pad != K:
        x2d = jnp.pad(x2d, ((0, 0), (0, K_pad - K)))

    # ---- path selection ------------------------------------------------------
    # x-resident: full x block + double-buffered weight panel + output block.
    x_res_bytes = 2 * M * K_pad * cb + 2 * K_pad * tn * cb + 2 * M * tn * ob
    # weight-resident: triple-buffered weight panel (Buffered(3) lookahead).
    w_res_bytes = 2 * tm * K_pad * cb + 3 * K_pad * tn * cb + 2 * tm * tn * ob

    if path is None:
        if x_res_bytes <= vmem_budget:
            path = "x_resident"
        elif w_res_bytes <= vmem_budget:
            path = "w_resident"
        else:
            path = "k_split"

    cost = pl.CostEstimate(
        flops=2 * M * K * N,
        transcendentals=0,
        bytes_accessed=M * K_pad * cb + K_pad * N * cb + M * N * ob,
    )

    def _limit(needed):
        return int(min(vmem_cap, max(needed + (8 << 20), 32 << 20)))

    if path == "x_resident":
        # 1-D grid over N panels.  x block index is constant -> DMA'd once and
        # resident; W and the output each cross HBM exactly once.
        out2d = pl.pallas_call(
            _fused_kernel,
            out_shape=jax.ShapeDtypeStruct((M, N), out_dtype),
            grid_spec=pltpu.PrefetchScalarGridSpec(
                num_scalar_prefetch=0,
                grid=(pl.cdiv(N, tn),),
                in_specs=[
                    pl.BlockSpec((M, K_pad), lambda j: (0, 0)),
                    pl.BlockSpec((K_pad, tn), lambda j: (0, j)),
                ],
                out_specs=pl.BlockSpec((M, tn), lambda j: (0, j)),
            ),
            compiler_params=pltpu.CompilerParams(
                dimension_semantics=("parallel",),
                vmem_limit_bytes=_limit(x_res_bytes),
            ),
            cost_estimate=cost,
        )(x2d, w_prepared)

    elif path == "w_resident":
        # 2-D grid (j outer, i inner): the (K_pad, tn) weight panel's block
        # index ignores i, so it is DMA'd once per j and reused across all M
        # tiles.  Buffered(3) gives one extra step of lookahead so the next
        # weight panel hides behind compute at each j boundary.  On v7x the
        # j (N) axis is the only "parallel" axis -> megacore halves weight
        # traffic instead of duplicating it.
        dims = ("parallel", "arbitrary") if is_v7 else ("parallel", "parallel")
        out2d = pl.pallas_call(
            _fused_kernel,
            out_shape=jax.ShapeDtypeStruct((M, N), out_dtype),
            grid_spec=pltpu.PrefetchScalarGridSpec(
                num_scalar_prefetch=0,
                grid=(pl.cdiv(N, tn), pl.cdiv(M, tm)),
                in_specs=[
                    pl.BlockSpec((tm, K_pad), lambda j, i: (i, 0)),
                    pl.BlockSpec((K_pad, tn), lambda j, i: (0, j),
                                 pipeline_mode=pl.Buffered(3)),
                ],
                out_specs=pl.BlockSpec((tm, tn), lambda j, i: (i, j)),
            ),
            compiler_params=pltpu.CompilerParams(
                dimension_semantics=dims,
                vmem_limit_bytes=_limit(w_res_bytes),
            ),
            cost_estimate=cost,
        )(x2d, w_prepared)

    else:  # "k_split" — very large K fallback: 3-D grid with K reduction last.
        accum_in_out = out_dtype == jnp.float32
        kernel = _accum_out_kernel if accum_in_out else _accum_scratch_kernel
        scratch = [] if accum_in_out else [pltpu.VMEM((tm, tn), jnp.float32)]
        needed = (2 * (tm * tk + tk * tn) * cb + 2 * tm * tn * ob
                  + (0 if accum_in_out else tm * tn * 4))
        out2d = pl.pallas_call(
            kernel,
            out_shape=jax.ShapeDtypeStruct((M, N), out_dtype),
            grid_spec=pltpu.PrefetchScalarGridSpec(
                num_scalar_prefetch=0,
                grid=(pl.cdiv(M, tm), pl.cdiv(N, tn), pl.cdiv(K_pad, tk)),
                in_specs=[
                    pl.BlockSpec((tm, tk), lambda i, j, k: (i, k)),
                    pl.BlockSpec((tk, tn), lambda i, j, k: (k, j)),
                ],
                out_specs=pl.BlockSpec((tm, tn), lambda i, j, k: (i, j)),
                scratch_shapes=scratch,
            ),
            compiler_params=pltpu.CompilerParams(
                dimension_semantics=("parallel", "parallel", "arbitrary"),
                vmem_limit_bytes=_limit(needed),
            ),
            cost_estimate=cost,
        )(x2d, w_prepared)

    return out2d.reshape(*lead, N)


# --------------------------- demo / self-test --------------------------------

if __name__ == "__main__":
    # Small shapes consistent with the module: vision_hidden_size=32 -> K=128.
    batch, seq = 2, 8
    vision_hidden_size, dim = 32, 256
    in_features = 4 * vision_hidden_size

    key = jax.random.PRNGKey(0)
    kx, kw = jax.random.split(key)

    x = jax.random.normal(kx, (batch, seq, in_features), dtype=jnp.float32)

    # Deterministic "nn.Linear(bias=False)"-style init: U(-1/sqrt(in), 1/sqrt(in)).
    bound = 1.0 / (in_features ** 0.5)
    w_torch = jax.random.uniform(
        kw, (dim, in_features), minval=-bound, maxval=bound, dtype=jnp.float32
    )

    # One-time weight prep (init-time; cache this — NOT done per forward).
    wp = prepare_projector_weight(w_torch, compute_dtype=jnp.bfloat16)

    out = jax.block_until_ready(vision_projector(x, wp))
    assert out.shape == (batch, seq, dim)

    # References (f32, and f32-on-bf16-rounded-operands for a tight check).
    ref_f32 = jnp.einsum("bsk,nk->bsn", x, w_torch)
    xb = x.astype(jnp.bfloat16).astype(jnp.float32)
    wb = w_torch.astype(jnp.bfloat16).astype(jnp.float32)
    ref_bf16 = jnp.einsum("bsk,nk->bsn", xb, wb)

    assert jnp.allclose(out, ref_f32, atol=3e-2, rtol=3e-2), "mismatch vs f32 ref"
    assert jnp.allclose(out, ref_bf16, atol=2e-3, rtol=2e-3), "mismatch vs bf16 ref"

    # Exercise the other code paths so they are compile- and numerics-checked:
    #   weight-resident (Buffered(3) weight panel lookahead, multi-j grid)
    out_w = jax.block_until_ready(
        vision_projector(x, wp, tm=16, tn=128, path="w_resident"))
    assert jnp.allclose(out_w, ref_bf16, atol=2e-3, rtol=2e-3), "w_resident mismatch"
    #   K-split fallback, accumulate-into-f32-output variant
    out_k = jax.block_until_ready(
        vision_projector(x, wp, tm=16, tn=128, tk=128, path="k_split"))
    assert jnp.allclose(out_k, ref_bf16, atol=2e-3, rtol=2e-3), "k_split mismatch"
    #   K-split fallback, scratch-accumulator variant with bf16 output
    out_kb = jax.block_until_ready(
        vision_projector(x, wp, tm=16, tn=128, tk=128, path="k_split",
                         out_dtype=jnp.bfloat16))
    assert jnp.allclose(out_kb.astype(jnp.float32), ref_bf16,
                        atol=2e-2, rtol=2e-2), "k_split bf16-out mismatch"

    print("KERNEL_OK")
</pallas_src>

<mosaic_0001>
module attributes {stable_mosaic.version = 11 : i64} {
  func.func @_fused_kernel(%arg0: i32, %arg1: memref<16x128xbf16, #tpu.memory_space<vmem>>, %arg2: memref<128x256xbf16, #tpu.memory_space<vmem>>, %arg3: memref<16x256xf32, #tpu.memory_space<vmem>>) attributes {dimension_semantics = [#tpu.dimension_semantics<parallel>], iteration_bounds = array<i64: 1>, scalar_prefetch = 0 : i64, scratch_operands = 0 : i64, tpu.core_type = #tpu.core_type<tc>, window_params = [{pipeline_mode = #tpu.pipeline_mode<synchronous>, transform_indices = @transform_0, window_bounds = array<i64: 16, 128>}, {transform_indices = @transform_1, window_bounds = array<i64: 128, 256>}, {transform_indices = @transform_2, window_bounds = array<i64: 16, 256>}]} {
    %c0 = arith.constant 0 : index
    %c0_0 = arith.constant 0 : index
    %0 = vector.load %arg1[%c0, %c0_0] : memref<16x128xbf16, #tpu.memory_space<vmem>>, vector<16x128xbf16>
    %c0_1 = arith.constant 0 : index
    %c0_2 = arith.constant 0 : index
    %1 = vector.load %arg2[%c0_1, %c0_2] : memref<128x256xbf16, #tpu.memory_space<vmem>>, vector<128x256xbf16>
    %cst = arith.constant dense<0.000000e+00> : vector<16x256xf32>
    %2 = tpu.matmul %0, %1, %cst {dimension_numbers = #tpu.dot_dimension_numbers<[1], [0], [0], [1], [0, 0, 1, 1], [], []>} : vector<16x128xbf16>, vector<128x256xbf16>, vector<16x256xf32> -> vector<16x256xf32>
    %c0_3 = arith.constant 0 : index
    %c0_4 = arith.constant 0 : index
    %3 = vector.load %arg3[%c0_3, %c0_4] : memref<16x256xf32, #tpu.memory_space<vmem>>, vector<16x256xf32>
    tpu.vector_store %arg3[%c0_3, %c0_4], %2 {strides = array<i32>} : memref<16x256xf32, #tpu.memory_space<vmem>>, vector<16x256xf32>,
    return
  }
  func.func @transform_0(%arg0: i32) -> (i32, i32) {
    %c0_i32 = arith.constant 0 : i32
    %c0_i32_0 = arith.constant 0 : i32
    %c0_i32_1 = arith.constant 0 : i32
    return %c0_i32, %c0_i32_0 : i32, i32
  }
  func.func @transform_1(%arg0: i32) -> (i32, i32) {
    %c0_i32 = arith.constant 0 : i32
    %c0_i32_0 = arith.constant 0 : i32
    return %c0_i32, %arg0 : i32, i32
  }
  func.func @transform_2(%arg0: i32) -> (i32, i32) {
    %c0_i32 = arith.constant 0 : i32
    %c0_i32_0 = arith.constant 0 : i32
    return %c0_i32, %arg0 : i32, i32
  }
}

</mosaic_0001>

<bundles_post_ra>
// kernel: tpu_custom_call.1
= control target key start
LH: loop header
LB: loop body
LE: loop exit
PB: predicated region body
PF: predicated region fallthrough
CT: control target
= control target key end

     0   :  { %7 = vsyncpa [#allocation3], 0  ;;  %s405_s0 = inlined_call_operand.hbm [shape: bf16[16,128], index: 0, kind: input, shape index: {}]   ;;  %s406_s1 = inlined_call_operand.hbm [shape: bf16[128,256], index: 1, kind: input, shape index: {}]   ;;  %s407_s2 = inlined_call_operand.hbm [shape: f32[16,256], index: 2, kind: output, shape index: {}]  }
   0x1   :  { %8 = vsyncpa [#allocation6], 0 }
   0x2   :  { %9 = vsyncpa [#allocation4], 0  ;;  %s14_s11 = sshll.u32 %s405_s0, 4  ;;  %s372_s12 = smov [#allocation2]   ;;  %s15_s11 = int_to_ptr.hbm [resolvable:$true] %s14_s11 }
   0x3   :  { %s16_s13 = sshll.u32 %s372_s12, 4  ;;  %s27_s16 = sshll.u32 %s406_s1, 4  ;;  %s17_s13 = int_to_ptr.vmem [resolvable:$true] %s16_s13  ;;  %s28_s16 = int_to_ptr.hbm [resolvable:$true] %s27_s16 }
   0x4   :  { %s373_s17 = smov 64   ;;  %s374_s18 = smov 4  }
   0x5   :  { %22 = dma.hbm_to_vmem [thread:$0]  %s15_s11, 128, %s17_s13, [#allocation3], %s373_s17, %s373_s17, %s374_s18  }
   0x6   :  { %s375_s19 = smov [#allocation5]   ;;  %s376_s21 = smov 128  }
   0x7   :  { %s29_s20 = sshll.u32 %s375_s19, 4  ;;  %s377_s22 = smov 8   ;;  %s30_s20 = int_to_ptr.vmem [resolvable:$true] %s29_s20 }
   0x8   :  { %35 = dma.hbm_to_vmem [thread:$0]  %s28_s16, 2048, %s30_s20, [#allocation6], %s376_s21, %s376_s21, %s377_s22  }
   0x9   :  { %366 = dma.done.wait [#allocation3], 128  }
   0xa   :  { %367 = vsyncadd [#allocation3], 4294967168 }
   0xb   :  { %368 = dma.done.wait [#allocation6], 2048  }
   0xc   :  { %369 = vsyncadd [#allocation6], 4294965248  ;;  %v262_v0 = vld [vmem:[#allocation5 + $0x70] sm:$0xf]  ;;  %v284_v1 = vld [vmem:[#allocation5 + $0x74] sm:$0xf0] }
   0xd   :  { %v283_v2 = vld [vmem:[#allocation5 + $0x74] sm:$0xf]  ;;  %v263_v3 = vor.u32 %v284_v1, %v262_v0  ;;  %v264_v4 = vld [vmem:[#allocation5 + $0x78] sm:$0xf0]  ;;  %v254_v5 = vld [vmem:[#allocation5 + $0x60] sm:$0xf] }
   0xe   :  { %v282_v6 = vld [vmem:[#allocation5 + $0x64] sm:$0xf0]  ;;  %v267_v7 = vor.u32 %v283_v2, %v264_v4  ;;  %v281_v8 = vld [vmem:[#allocation5 + $0x64] sm:$0xf]  ;;  %v256_v9 = vld [vmem:[#allocation5 + $0x68] sm:$0xf0] }
   0xf   :  { %148 = vmatpush.bf16.msra.mxu0 %v263_v3  ;;  %v255_v10 = vor.u32 %v282_v6, %v254_v5  ;;  %v259_v11 = vor.u32 %v281_v8, %v256_v9  ;;  %v246_v12 = vld [vmem:[#allocation5 + $0x50] sm:$0xf]  ;;  %v280_v13 = vld [vmem:[#allocation5 + $0x54] sm:$0xf0]  ;;  %v279_v14 = vld [vmem:[#allocation5 + $0x54] sm:$0xf] }
  0x10   :  { %162 = vmatpush.bf16.msra.mxu1 %v267_v7  ;;  %v248_v15 = vld [vmem:[#allocation5 + $0x58] sm:$0xf0]  ;;  %v247_v16 = vor.u32 %v280_v13, %v246_v12  ;;  %v238_v18 = vld [vmem:[#allocation5 + $0x40] sm:$0xf]  ;;  %v278_v19 = vld [vmem:[#allocation5 + $0x44] sm:$0xf0] }
  0x11   :  { %v251_v17 = vor.u32 %v279_v14, %v248_v15  ;;  %v277_v20 = vld [vmem:[#allocation5 + $0x44] sm:$0xf]  ;;  %v240_v21 = vld [vmem:[#allocation5 + $0x48] sm:$0xf0]  ;;  %v239_v22 = vor.u32 %v278_v19, %v238_v18  ;;  %v230_v24 = vld [vmem:[#allocation5 + $0x30] sm:$0xf] }
  0x12   :  { %v243_v23 = vor.u32 %v277_v20, %v240_v21  ;;  %v276_v25 = vld [vmem:[#allocation5 + $0x34] sm:$0xf0]  ;;  %v275_v26 = vld [vmem:[#allocation5 + $0x34] sm:$0xf]  ;;  %v232_v27 = vld [vmem:[#allocation5 + $0x38] sm:$0xf0] }
  0x13   :  { %149 = vmatpush.bf16.msra.mxu0 %v255_v10  ;;  %v231_v28 = vor.u32 %v276_v25, %v230_v24  ;;  %v235_v29 = vor.u32 %v275_v26, %v232_v27  ;;  %v222_v30 = vld [vmem:[#allocation5 + $0x20] sm:$0xf]  ;;  %v274_v31 = vld [vmem:[#allocation5 + $0x24] sm:$0xf0]  ;;  %v273_v32 = vld [vmem:[#allocation5 + $0x24] sm:$0xf] }
  0x14   :  { %163 = vmatpush.bf16.msra.mxu1 %v259_v11  ;;  %v224_v33 = vld [vmem:[#allocation5 + $0x28] sm:$0xf0]  ;;  %v223_v34 = vor.u32 %v274_v31, %v222_v30  ;;  %v214_v36 = vld [vmem:[#allocation5 + $0x10] sm:$0xf]  ;;  %v272_v37 = vld [vmem:[#allocation5 + $0x14] sm:$0xf0] }
  0x15   :  { %v227_v35 = vor.u32 %v273_v32, %v224_v33  ;;  %v271_v38 = vld [vmem:[#allocation5 + $0x14] sm:$0xf]  ;;  %v216_v39 = vld [vmem:[#allocation5 + $0x18] sm:$0xf0]  ;;  %v215_v40 = vor.u32 %v272_v37, %v214_v36  ;;  %v206_v42 = vld [vmem:[#allocation5] sm:$0xf] }
  0x16   :  { %v219_v41 = vor.u32 %v271_v38, %v216_v39  ;;  %v270_v43 = vld [vmem:[#allocation5 + $0x4] sm:$0xf0]  ;;  %v269_v44 = vld [vmem:[#allocation5 + $0x4] sm:$0xf]  ;;  %v208_v45 = vld [vmem:[#allocation5 + $0x8] sm:$0xf0] }
  0x17   :  { %150 = vmatpush.bf16.msra.mxu0 %v247_v16  ;;  %v207_v46 = vor.u32 %v270_v43, %v206_v42  ;;  %v211_v47 = vor.u32 %v269_v44, %v208_v45  ;;  %v268_v48 = vld [vmem:[#allocation2] sm:$0xff]  ;;  %s378_s0 = smov [#allocation7]   ;;  %s186_s25 = sshll.u32 %s407_s2, 4  ;;  %s187_s25 = int_to_ptr.hbm [resolvable:$true] %s186_s25 }
  0x18   :  { %164 = vmatpush.bf16.msra.mxu1 %v251_v17  ;;  %s184_s1 = sshll.u32 %s378_s0, 4  ;;  %s379_s26 = smov 256   ;;  %s185_s1 = int_to_ptr.vmem [resolvable:$true] %s184_s1 }
  0x19   :  { %s380_s27 = smov 16  }
  0x1b   :  { %151 = vmatpush.bf16.msra.mxu0 %v239_v22 }
  0x1c   :  { %165 = vmatpush.bf16.msra.mxu1 %v243_v23 }
  0x1f   :  { %152 = vmatpush.bf16.msra.mxu0 %v231_v28 }
  0x20   :  { %166 = vmatpush.bf16.msra.mxu1 %v235_v29 }
  0x23   :  { %153 = vmatpush.bf16.msra.mxu0 %v223_v34 }
  0x24   :  { %167 = vmatpush.bf16.msra.mxu1 %v227_v35 }
  0x27   :  { %154 = vmatpush.bf16.msra.mxu0 %v215_v40 }
  0x28   :  { %168 = vmatpush.bf16.msra.mxu1 %v219_v41 }
  0x2b   :  { %155 = vmatpush.bf16.msra.mxu0 %v207_v46 }
  0x2c   :  { %169 = vmatpush.bf16.msra.mxu1 %v211_v47 }
  0x2e   :  { %156 = vmatmul.bf16.vlgmr.msra.gmra.mxu0 %v268_v48 }
  0x2f   :  { %170 = vmatmul.bf16.vlgmr.msra.gmra.mxu1 %v268_v48 }
  0xab   :  { %v157_v49 = vpop.f32.mrf.mxu0 }
  0xac   :  { %176 = vst [vmem:[#allocation7] sm:$0xff] %v157_v49  ;;  %v171_v50 = vpop.f32.mrf.mxu1 }
  0xad   :  { %177 = vst [vmem:[#allocation7 + $0x8] sm:$0xff] %v171_v50 }
  0xb3   :  { %v159_v51 = vpop.f32.mrf.mxu0 }
  0xb4   :  { %178 = vst [vmem:[#allocation7 + $0x10] sm:$0xff] %v159_v51  ;;  %v173_v52 = vpop.f32.mrf.mxu1 }
  0xb5   :  { %179 = vst [vmem:[#allocation7 + $0x18] sm:$0xff] %v173_v52 }
  0xb6   :  { %192 = dma.vmem_to_hbm [thread:$0]  %s185_s1, 512, %s187_s25, [#allocation4], %s379_s26, %s379_s26, %s380_s27  }
  0xb7   :  { %370 = dma.done.wait [#allocation4], 512  }
  0xb8   :  { %371 = vsyncadd [#allocation4], 4294966784 }
  0xb9   :  { %197 = vsyncpa [#allocation3], 1 }
  0xba   :  { %198 = vsyncpa [#allocation6], 1 }
  0xbb   :  { %199 = vsyncpa [#allocation4], 1 }

</bundles_post_ra>
